<compile_context>
chip_gen: v7x
topology: tpu7x:2x2x1
jax: 0.10.0
libtpu: 0.0.40
codegen_flags: <defaults>
</compile_context>

<pallas_src>
import functools

import jax
import jax.numpy as jnp
from jax import lax
from jax.experimental import pallas as pl
from jax.experimental.pallas import tpu as pltpu


def _round_up(x, m):
    return ((x + m - 1) // m) * m


@functools.lru_cache(maxsize=1)
def _vmem_capacity_bytes():
    try:
        return int(pltpu.get_tpu_info().vmem_capacity_bytes)
    except Exception:
        return 64 * 1024 * 1024  # conservative fallback (v7x per-TC VMEM)


def _probe_kernel(x_ref, w_ref, b_ref, o_ref, acc_ref, *,
                  inv_s, seq_len, ts, needs_mask):
    # x_ref:   (TB, TS, D)  streamed feature tile
    # w_ref:   (D, Cp)      VMEM-resident weight (pre-transposed, bf16)
    # b_ref:   (1, Cp)      VMEM-resident bias (f32)
    # o_ref:   (TB, Cp)     output logits tile (same block for every S step)
    # acc_ref: (TB, D) f32  scratch accumulator (raw sum over sequence)
    s = pl.program_id(1)

    @pl.when(s == 0)
    def _():
        acc_ref[...] = jnp.zeros_like(acc_ref)

    x = x_ref[...]
    if needs_mask:
        # The last sequence tile overhangs the true S; out-of-bounds reads are
        # unspecified, so zero them before accumulating.
        d = x_ref.shape[-1]
        seq_idx = s * ts + lax.broadcasted_iota(jnp.int32, (ts, d), 0)  # (TS,D)
        x = jnp.where(seq_idx < seq_len, x, jnp.array(0, x.dtype))

    # Reduce with an f32 accumulation dtype (keeps any upcast fused; no
    # materialized full-tile f32 copy for bf16/int8 inputs).
    acc_ref[...] += jnp.sum(x, axis=1, dtype=jnp.float32)

    @pl.when(s == pl.num_programs(1) - 1)
    def _():
        pooled = acc_ref[...] * inv_s                      # mean over true S
        # Single-pass bf16 MXU matmul with f32 accumulation.
        logits = jnp.dot(pooled.astype(w_ref.dtype), w_ref[...],
                         preferred_element_type=jnp.float32)
        o_ref[...] = (logits + b_ref[...]).astype(o_ref.dtype)


@functools.partial(jax.jit, static_argnames=("num_classes", "tb", "ts"))
def linear_probe_forward(features, weight_t, bias2d, num_classes,
                         tb=None, ts=None):
    """
    features: (B, S, D)             -- probed-layer activations (f32 or bf16)
    weight_t: (D, Cp)  bfloat16     -- Linear weight, pre-transposed, C-padded
    bias2d:   (1, Cp)  float32      -- bias, C-padded, 2-D for lane layout
    returns:  (B, num_classes) float32 logits
    """
    B, S, D = features.shape
    Dw, Cp = weight_t.shape
    assert Dw == D
    itemsize = jnp.dtype(features.dtype).itemsize
    packing = max(8, 32 // itemsize)         # sublane packing: f32/bf16/int8 -> 8/16/32

    # ---- generation-aware budgets ------------------------------------------
    cap = _vmem_capacity_bytes()
    if cap >= 100 * 1024 * 1024:             # v5e / v6e: 128 MiB VMEM
        tile_budget = 14 * 1024 * 1024
        vmem_limit = 96 * 1024 * 1024
    else:                                    # v7x: 64 MiB per-TC VMEM
        tile_budget = 10 * 1024 * 1024
        vmem_limit = 52 * 1024 * 1024

    # ---- batch tile ----------------------------------------------------------
    if tb is not None:
        TB = tb
    elif B < 8:
        TB = B                               # block == full dim, no overhang
    else:
        # Fill MXU rows, but keep >= 2 batch tiles (v7x megacore sharding) and
        # never let the block exceed the array extent.
        TB = min(128, max(8, (B // 2) // 8 * 8), (B // 8) * 8)

    # ---- sequence tile -------------------------------------------------------
    if ts is not None:
        TS = ts
    elif S <= packing:
        TS = S                               # block == full dim
    else:
        TS = max(packing,
                 (tile_budget // (TB * D * itemsize)) // packing * packing)
        TS = min(TS, (S // packing) * packing)

    grid = (pl.cdiv(B, TB), pl.cdiv(S, TS))
    B_pad = _round_up(B, TB)
    needs_mask = (S % TS) != 0               # ragged sequence tail -> in-kernel mask

    cost = pl.CostEstimate(
        flops=2 * B * D * Cp + B * S * D,
        transcendentals=0,
        bytes_accessed=(B * S * D * itemsize
                        + D * Cp * jnp.dtype(weight_t.dtype).itemsize
                        + B_pad * Cp * 4),
    )

    out = pl.pallas_call(
        functools.partial(_probe_kernel, inv_s=1.0 / S, seq_len=S, ts=TS,
                          needs_mask=needs_mask),
        out_shape=jax.ShapeDtypeStruct((B_pad, Cp), jnp.float32),
        grid_spec=pltpu.PrefetchScalarGridSpec(
            num_scalar_prefetch=0,
            grid=grid,
            in_specs=[
                # Streamed, double-buffered feature tiles.
                pl.BlockSpec((TB, TS, D), lambda b, s: (b, s, 0)),
                # Weight / bias: index_map ignores the grid -> fetched once,
                # VMEM-resident; Buffered(1) drops the useless second buffer.
                pl.BlockSpec((D, Cp), lambda b, s: (0, 0),
                             pipeline_mode=pl.Buffered(1)),
                pl.BlockSpec((1, Cp), lambda b, s: (0, 0),
                             pipeline_mode=pl.Buffered(1)),
            ],
            # Output block independent of the S (reduction) axis: accumulator.
            out_specs=pl.BlockSpec((TB, Cp), lambda b, s: (b, 0)),
            scratch_shapes=[pltpu.VMEM((TB, D), jnp.float32)],
        ),
        compiler_params=pltpu.CompilerParams(
            dimension_semantics=("parallel", "arbitrary"),
            vmem_limit_bytes=vmem_limit,
        ),
        cost_estimate=cost,
    )(features, weight_t, bias2d)

    return out[:B, :num_classes]


class LinearProbeClassifier:
    """JAX/Pallas port of the PyTorch LinearProbeClassifier (mean-pool + Linear)."""

    def __init__(self, feature_dim=1152, num_classes=1000, layer_idx=14, key=None):
        if key is None:
            key = jax.random.PRNGKey(0)
        kw, kb = jax.random.split(key)
        # Deterministic init mimicking nn.Linear: U(-1/sqrt(D), 1/sqrt(D)).
        bound = 1.0 / (feature_dim ** 0.5)
        self.weight = jax.random.uniform(
            kw, (num_classes, feature_dim), jnp.float32, -bound, bound)
        self.bias = jax.random.uniform(
            kb, (num_classes,), jnp.float32, -bound, bound)
        self.layer_idx = layer_idx
        self.num_classes = num_classes

        # Hoisted, kernel-friendly parameter layout (done once, not per call):
        #  - transpose to (D, C) for a row-major MXU contraction,
        #  - zero-pad C up to a multiple of 128 for lane-dense output stores,
        #  - store the resident weight in bf16 (halves VMEM + its one-time DMA;
        #    MXU is bf16-native on v6e/v7x; accumulation stays f32).
        c_pad = _round_up(num_classes, 128)
        w_t = jnp.pad(jnp.transpose(self.weight),
                      ((0, 0), (0, c_pad - num_classes)))
        self.weight_t = w_t.astype(jnp.bfloat16)
        self.bias2d = jnp.pad(
            self.bias, (0, c_pad - num_classes)).reshape(1, c_pad).astype(jnp.float32)
        # NOTE: for very large num_classes (e.g. 32k-vocab probes) a third
        # "parallel" grid axis over C (weight block (D, TN)) would keep the
        # resident weight bounded; unnecessary at C ~ 1000.

    def __call__(self, x, tb=None, ts=None):
        if self.layer_idx not in x:
            raise KeyError(
                f"Layer index {self.layer_idx} not found in the provided features.")
        layer_features = x[self.layer_idx]          # (B, S, D)
        return linear_probe_forward(layer_features, self.weight_t, self.bias2d,
                                    self.num_classes, tb=tb, ts=ts)


if __name__ == "__main__":
    key = jax.random.PRNGKey(0)
    k_feat, k_params = jax.random.split(key)

    B, S, D, C = 2, 20, 128, 128          # small, ragged-S shapes
    layer_idx = 14

    features = jax.random.normal(k_feat, (B, S, D), dtype=jnp.float32)
    x = {layer_idx: features}

    model = LinearProbeClassifier(feature_dim=D, num_classes=C,
                                  layer_idx=layer_idx, key=k_params)

    # Pure-JAX f32 reference of the same semantics.
    ref = jnp.mean(features, axis=1) @ model.weight.T + model.bias

    # Default tiling: ragged last S tile exercises the in-kernel mask.
    logits = model(x)
    jax.block_until_ready(logits)
    assert logits.shape == (B, C)
    # Tolerance covers the bf16-resident weight (negligible for a linear probe).
    assert jnp.allclose(logits, ref, atol=1e-2, rtol=1e-2), "mismatch vs reference"

    # Force a multi-step sequence reduction (grid=(1, 3), masked last S tile)
    # to exercise the VMEM accumulator / pl.when init+finalize path.
    logits_tiled = model(x, ts=8)
    jax.block_until_ready(logits_tiled)
    assert jnp.allclose(logits_tiled, ref, atol=1e-2, rtol=1e-2), "tiled mismatch"
    # Different tilings must agree up to f32 accumulation-order noise.
    assert jnp.allclose(logits_tiled, logits, atol=1e-4, rtol=1e-4), "tiling divergence"

    print("KERNEL_OK")
</pallas_src>

<mosaic_0001>
module attributes {stable_mosaic.version = 11 : i64} {
  func.func @_probe_kernel(%arg0: i32, %arg1: i32, %arg2: memref<2x16x128xf32, #tpu.memory_space<vmem>>, %arg3: memref<128x128xbf16, #tpu.memory_space<vmem>>, %arg4: memref<1x128xf32, #tpu.memory_space<vmem>>, %arg5: memref<2x128xf32, #tpu.memory_space<vmem>>, %arg6: memref<2x128xf32, #tpu.memory_space<vmem>>) attributes {dimension_semantics = [#tpu.dimension_semantics<parallel>, #tpu.dimension_semantics<arbitrary>], iteration_bounds = array<i64: 1, 2>, scalar_prefetch = 0 : i64, scratch_operands = 1 : i64, tpu.core_type = #tpu.core_type<tc>, window_params = [{transform_indices = @transform_0, window_bounds = array<i64: 2, 16, 128>}, {pipeline_mode = #tpu.pipeline_mode<synchronous>, transform_indices = @transform_1, window_bounds = array<i64: 128, 128>}, {pipeline_mode = #tpu.pipeline_mode<synchronous>, transform_indices = @transform_2, window_bounds = array<i64: 1, 128>}, {transform_indices = @transform_3, window_bounds = array<i64: 2, 128>}]} {
    %c0_i32 = arith.constant 0 : i32
    %0 = arith.cmpi eq, %arg1, %c0_i32 : i32
    %1 = arith.extui %0 : i1 to i32
    %c0_i32_0 = arith.constant 0 : i32
    %2 = arith.cmpi ne, %1, %c0_i32_0 : i32
    scf.if %2 {
      %cst_9 = arith.constant 0.000000e+00 : f32
      %21 = vector.broadcast %cst_9 : f32 to vector<2x128xf32>
      %c0_10 = arith.constant 0 : index
      %c0_11 = arith.constant 0 : index
      %22 = vector.load %arg6[%c0_10, %c0_11] : memref<2x128xf32, #tpu.memory_space<vmem>>, vector<2x128xf32>
      tpu.vector_store %arg6[%c0_10, %c0_11], %21 {strides = array<i32>} : memref<2x128xf32, #tpu.memory_space<vmem>>, vector<2x128xf32>,
    } else {
    }
    %c0 = arith.constant 0 : index
    %c0_1 = arith.constant 0 : index
    %c0_2 = arith.constant 0 : index
    %3 = vector.load %arg2[%c0, %c0_1, %c0_2] : memref<2x16x128xf32, #tpu.memory_space<vmem>>, vector<2x16x128xf32>
    %c16_i32 = arith.constant 16 : i32
    %4 = arith.muli %arg1, %c16_i32 : i32
    %5 = tpu.iota {dimensions = array<i32: 0>} : vector<16x128xi32>
    %6 = vector.broadcast %4 : i32 to vector<16x128xi32>
    %7 = arith.addi %6, %5 : vector<16x128xi32>
    %c20_i32 = arith.constant 20 : i32
    %8 = vector.broadcast %c20_i32 : i32 to vector<16x128xi32>
    %9 = arith.cmpi slt, %7, %8 : vector<16x128xi32>
    %cst = arith.constant 0.000000e+00 : f32
    %10 = vector.shape_cast %9 : vector<16x128xi1> to vector<1x16x128xi1>
    %11 = vector.broadcast %10 : vector<1x16x128xi1> to vector<2x16x128xi1>
    %12 = vector.broadcast %cst : f32 to vector<2x16x128xf32>
    %13 = arith.select %11, %3, %12 : vector<2x16x128xi1>, vector<2x16x128xf32>
    %c0_3 = arith.constant 0 : index
    %c0_4 = arith.constant 0 : index
    %14 = vector.load %arg6[%c0_3, %c0_4] : memref<2x128xf32, #tpu.memory_space<vmem>>, vector<2x128xf32>
    %cst_5 = arith.constant dense<0.000000e+00> : vector<2x128xf32>
    %15 = vector.multi_reduction <add>, %13, %cst_5 [1] : vector<2x16x128xf32> to vector<2x128xf32>
    %16 = arith.addf %14, %15 : vector<2x128xf32>
    %c0_6 = arith.constant 0 : index
    %c0_7 = arith.constant 0 : index
    %17 = vector.load %arg6[%c0_6, %c0_7] : memref<2x128xf32, #tpu.memory_space<vmem>>, vector<2x128xf32>
    tpu.vector_store %arg6[%c0_6, %c0_7], %16 {strides = array<i32>} : memref<2x128xf32, #tpu.memory_space<vmem>>, vector<2x128xf32>,
    %c1_i32 = arith.constant 1 : i32
    %18 = arith.cmpi eq, %arg1, %c1_i32 : i32
    %19 = arith.extui %18 : i1 to i32
    %c0_i32_8 = arith.constant 0 : i32
    %20 = arith.cmpi ne, %19, %c0_i32_8 : i32
    scf.if %20 {
      %c0_9 = arith.constant 0 : index
      %c0_10 = arith.constant 0 : index
      %21 = vector.load %arg6[%c0_9, %c0_10] : memref<2x128xf32, #tpu.memory_space<vmem>>, vector<2x128xf32>
      %cst_11 = arith.constant 5.000000e-02 : f32
      %22 = vector.broadcast %cst_11 : f32 to vector<2x128xf32>
      %23 = arith.mulf %21, %22 : vector<2x128xf32>
      %24 = arith.truncf %23 : vector<2x128xf32> to vector<2x128xbf16>
      %c0_12 = arith.constant 0 : index
      %c0_13 = arith.constant 0 : index
      %25 = vector.load %arg3[%c0_12, %c0_13] : memref<128x128xbf16, #tpu.memory_space<vmem>>, vector<128x128xbf16>
      %cst_14 = arith.constant dense<0.000000e+00> : vector<2x128xf32>
      %26 = tpu.matmul %24, %25, %cst_14 {dimension_numbers = #tpu.dot_dimension_numbers<[1], [0], [0], [1], [0, 0, 1, 1], [], []>} : vector<2x128xbf16>, vector<128x128xbf16>, vector<2x128xf32> -> vector<2x128xf32>
      %c0_15 = arith.constant 0 : index
      %c0_16 = arith.constant 0 : index
      %27 = vector.load %arg4[%c0_15, %c0_16] : memref<1x128xf32, #tpu.memory_space<vmem>>, vector<1x128xf32>
      %28 = vector.broadcast %27 : vector<1x128xf32> to vector<2x128xf32>
      %29 = arith.addf %26, %28 : vector<2x128xf32>
      %c0_17 = arith.constant 0 : index
      %c0_18 = arith.constant 0 : index
      %30 = vector.load %arg5[%c0_17, %c0_18] : memref<2x128xf32, #tpu.memory_space<vmem>>, vector<2x128xf32>
      tpu.vector_store %arg5[%c0_17, %c0_18], %29 {strides = array<i32>} : memref<2x128xf32, #tpu.memory_space<vmem>>, vector<2x128xf32>,
    } else {
    }
    return
  }
  func.func @transform_0(%arg0: i32, %arg1: i32) -> (i32, i32, i32) {
    %c0_i32 = arith.constant 0 : i32
    %c0_i32_0 = arith.constant 0 : i32
    return %arg0, %arg1, %c0_i32 : i32, i32, i32
  }
  func.func @transform_1(%arg0: i32, %arg1: i32) -> (i32, i32) {
    %c0_i32 = arith.constant 0 : i32
    %c0_i32_0 = arith.constant 0 : i32
    %c0_i32_1 = arith.constant 0 : i32
    return %c0_i32, %c0_i32_0 : i32, i32
  }
  func.func @transform_2(%arg0: i32, %arg1: i32) -> (i32, i32) {
    %c0_i32 = arith.constant 0 : i32
    %c0_i32_0 = arith.constant 0 : i32
    %c0_i32_1 = arith.constant 0 : i32
    return %c0_i32, %c0_i32_0 : i32, i32
  }
  func.func @transform_3(%arg0: i32, %arg1: i32) -> (i32, i32) {
    %c0_i32 = arith.constant 0 : i32
    %c0_i32_0 = arith.constant 0 : i32
    return %arg0, %c0_i32 : i32, i32
  }
}

</mosaic_0001>

<bundles_post_ra>
// kernel: linear_probe_forward.1
= control target key start
LH: loop header
LB: loop body
LE: loop exit
PB: predicated region body
PF: predicated region fallthrough
CT: control target
= control target key end

     0   :  { %8 = vsyncpa [#allocation5], 0  ;;  %s942_s12 = smov 0   ;;  %s944_s13 = smov 0   ;;  %s1108_s0 = inlined_call_operand.vmem [shape: f32[2,20,128], index: 0, kind: input, shape index: {}]   ;;  %s1109_s1 = inlined_call_operand.vmem [shape: bf16[128,128], index: 1, kind: input, shape index: {}]   ;;  %s1110_s2 = inlined_call_operand.vmem [shape: f32[1,128], index: 2, kind: input, shape index: {}]   ;;  %s1111_s3 = inlined_call_operand.hbm [shape: f32[2,128], index: 3, kind: output, shape index: {}]  }
   0x1   :  { %s946_s14 = smov 0   ;;  %s948_s15 = smov 0  }
   0x2   :  { %s950_s16 = smov 0  }
   0x3 LB: > { %s594_s17 = sadd.s32 4294967295, %s884_s16   ;;  %s23_s18 = sadd.s32 1, %s880_s15  ;;  %s884_s16 = sphi %s950_s16, %s14_s16   ;;  %s880_s15 = sphi %s948_s15, %s1119_s15   ;;  %s876_s14 = sphi %s946_s14, %s1118_s14   ;;  %s872_s13 = sphi %s944_s13, %s1117_s13   ;;  %s868_s12 = sphi %s942_s12, %s1116_s12  }
   0x4   : > { %p24_p0 = scmp.ge.s32.totalorder %s23_s18, 2  ;;  %p42_p1 = scmp.ne.s32.totalorder %s872_s13, %s868_s12 }
   0x5   : > { %p43_p2 = scmp.eq.s32.totalorder %s884_s16, 0  ;;  %s35_s20 = sadd.s32 1, %s872_s13 }
   0x6   : > { %s1121_s18 = smov (%p24_p0, %s23_s18), 0  ;;  %p596_p5 = scmp.ge.s32.totalorder %s884_s16, 2 }
   0x7   : > { %p44_p3 = por %p43_p2, %p42_p1  ;;  %s31_s19 = ssub.s32 %s880_s15, %s1121_s18 }
   0x8   : > { %p33_p4 = scmp.eq.s32.totalorder %s31_s19, 0  ;;  %142 = sbr.rel (%p596_p5) target bundleno = 71 (0x47), region = 24 }
   0xa   : > { %s978_s21 = scalar_select %p33_p4, %s872_s13, %s35_s20  }
   0xf   : > { %145 = sbr.rel (!%p44_p3) target bundleno = 71 (0x47), region = 28  ;;  %s147_s22 = sand.u32 (%p44_p3), 1, %s872_s13  }
  0x10   : > { %s598_s23 = sshll.u32 (%p44_p3), %s880_s15, 1  ;;  %s597_s24 = sshll.u32 (%p44_p3), %s147_s22, 5 }
  0x11   : > { %s152_s25 = ssub.s32 (%p44_p3), 3, %s598_s23  ;;  %s630_s26 = sshll.u32 (%p44_p3), %s880_s15, 4 }
  0x12   : > { %p153_p6 = scmp.lt.s32.totalorder (%p44_p3), %s152_s25, 2  ;;  %s989_s29 = scalar_lea.vmem (%p44_p3), %s1108_s0, %s630_s26  }
  0x13   : > { %s992_s4 = scalar_lea.vmem (%p44_p3), [#allocation3], %s597_s24  }
  0x16   : > { %s1123_s25 = smov (!%p153_p6, %s152_s25), 2 }
  0x17   : > { %s599_s30 = sshll.u32 %s1123_s25, 8 }
  0x18   : > { %p602_p7 = scmp.eq.s32.totalorder %s599_s30, 0 }
  0x19   : > { %s995_s5 = sshrl.u32 (!%p602_p7), %s1123_s25, 1 }
  0x1a   : > { %163 = sbr.rel (%p602_p7) target bundleno = 71 (0x47), region = 32  ;;  %p603_p8 = scmp.le.s32.totalorder (!%p602_p7), %s995_s5, 0 }
  0x21   : > { %545 = sbr.rel (%p603_p8) target bundleno = 50 (0x32), region = 127  ;;  %s1112_s6 = smov (!%p603_p8), %s992_s4 }
  0x22   : > { %s1113_s7 = smov (!%p603_p8), %s989_s29  ;;  %s1004_s8 = smov (!%p603_p8), 0  }
  0x23   : > { %s898_s9 = smov (!%p603_p8), 0  }
  0x28 LB: >> { %v233_v0 = vld [vmem:[%s892_s7] sm:$0xff]  ;;  %v235_v1 = vld [vmem:[%s892_s7 + $0x8] sm:$0xff]  ;;  %v237_v2 = vld [vmem:[%s892_s7 + $0x18] sm:$0xff]  ;;  %s241_s10 = sadd.s32 1, %s896_s8  ;;  %s227_s9 = sadd.s32 1, %s900_s9   ;;  %s900_s9 = sphi %s898_s9, %s227_s9   ;;  %s896_s8 = sphi %s1004_s8, %s1114_s8   ;;  %s892_s7 = sphi %s1113_s7, %s246_s7   ;;  %s888_s6 = sphi %s1112_s6, %s247_s6  }
  0x29   : >> { %234 = vst [vmem:[%s888_s6] sm:$0xff] %v233_v0  ;;  %236 = vst [vmem:[%s888_s6 + $0x8] sm:$0xff] %v235_v1  ;;  %v239_v3 = vld [vmem:[%s892_s7 + $0x20] sm:$0xff]  ;;  %p242_p9 = scmp.ge.s32.totalorder %s241_s10, %s995_s5  ;;  %p226_p10 = scmp.ge.s32.totalorder %s227_s9, %s995_s5 }
  0x2a   : >> { %238 = vst [vmem:[%s888_s6 + $0x10] sm:$0xff] %v237_v2  ;;  %240 = vst [vmem:[%s888_s6 + $0x18] sm:$0xff] %v239_v3 }
  0x2b   : >> { %s1125_s10 = smov (%p242_p9, %s241_s10), 0  ;;  %229 = sbr.rel (!%p226_p10) target bundleno = 40 (0x28), region = 133 }
  0x2c   : >> { %s604_s11 = sshll.u32 %s1125_s10, 4  ;;  %s1114_s8 = smov %s1125_s10 }
  0x2d   : >> { %s246_s7 = scalar_lea.vmem %s989_s29, %s604_s11   ;;  %s247_s6 = scalar_lea.vmem %s992_s4, %s604_s11 [#allocation3]  }
  0x32 PF: > { %s1020_s19 = sand.u32 1, %s1123_s25   ;;  %s631_s20 = sshll.u32 %s995_s5, 4 }
  0x33   : > { %s1024_s22 = scalar_lea.vmem %s989_s29, %s631_s20   ;;  %s254_s23 = scalar_lea.vmem %s992_s4, %s631_s20 [#allocation3]  }
  0x34   : > { %p609_p11 = scmp.le.s32.totalorder %s1020_s19, 0 }
  0x35   : > { %s902_s24 = smov (!%p609_p11), %s254_s23   ;;  %s906_s26 = smov (!%p609_p11), %s1024_s22  }
  0x36   : > { %559 = sbr.rel (%p609_p11) target bundleno = 71 (0x47), region = 138  ;;  %s910_s27 = smov (!%p609_p11), 0  }
  0x37   : > { %s914_s28 = smov (!%p609_p11), 0  }
  0x3d LB: >> { %v264_v4 = vld [vmem:[%s908_s26] sm:$0xff]  ;;  %v266_v5 = vld [vmem:[%s908_s26 + $0x18] sm:$0xff]  ;;  %s268_s25 = sadd.s32 1, %s912_s27  ;;  %s258_s28 = sadd.s32 1, %s916_s28   ;;  %s916_s28 = sphi %s914_s28, %s258_s28   ;;  %s912_s27 = sphi %s910_s27, %s911_s27   ;;  %s908_s26 = sphi %s906_s26, %s273_s26   ;;  %s904_s24 = sphi %s902_s24, %s274_s24  }
  0x3e   : >> { %265 = vst [vmem:[%s904_s24] sm:$0xff] %v264_v4  ;;  %267 = vst [vmem:[%s904_s24 + $0x10] sm:$0xff] %v266_v5  ;;  %p269_p12 = scmp.ge.s32.totalorder %s268_s25, %s1020_s19  ;;  %p257_p13 = scmp.ge.s32.totalorder %s258_s28, %s1020_s19 }
  0x40   : >> { %s1127_s25 = smov (%p269_p12, %s268_s25), 0  ;;  %260 = sbr.rel (!%p257_p13) target bundleno = 61 (0x3d), region = 144 }
  0x41   : >> { %s610_s29 = sshll.u32 %s1127_s25, 3  ;;  %s911_s27 = smov %s1127_s25  }
  0x42   : >> { %s273_s26 = scalar_lea.vmem %s1024_s22, %s610_s29   ;;  %s274_s24 = scalar_lea.vmem %s254_s23, %s610_s29 [#allocation3]  }
  0x47 PF: > { %p612_p0 = scmp.ge.s32.totalorder %s884_s16, 1  ;;  %p279_p1 = scmp.lt.s32.totalorder %s884_s16, 3 }
  0x49   : > { %p280_p2 = pnand %p612_p0, %p279_p1 }
  0x4a   : > { %s286_s30 = sand.u32 (!%p280_p2), 1, %s868_s12   ;;  %p614_p3 = scmp.ne.s32.totalorder (!%p280_p2), %s876_s14, 0 }
  0x4b   : > { %283 = sbr.rel (%p280_p2) target bundleno = 368 (0x170), region = 80  ;;  %s613_s4 = sshll.u32 (!%p280_p2), %s286_s30, 5 }
  0x4c   : > { %s288_s5 = scalar_lea.vmem (!%p280_p2), [#allocation3], %s613_s4 }
  0x52   : > { %314 = sbr.rel (%p614_p3) target bundleno = 89 (0x59), region = 88  ;;  %v918_v6 = vmov (!%p614_p3), 0.0  }
  0x53   : > { %315 = vst [vmem:[#allocation2] sm:$0x3] (!%p614_p3), %v918_v6 }
  0x59 PF: > { %s615_s6 = sshll.u32 %s876_s14, 4  ;;  %v321_v7 = vlaneseq  ;;  %v316_v10 = vld [vmem:[%s288_s5] sm:$0xff]  ;;  %v318_v11 = vld [vmem:[%s288_s5 + $0x10] sm:$0xff]  ;;  %v317_v14 = vld [vmem:[%s288_s5 + $0x8] sm:$0xff]  ;;  %vm354_vm2 = vcmask 1041409   ;;  %p616_p4 = scmp.ne.s32.totalorder %s876_s14, 1 }
  0x5a   : > { %v324_v8 = vstv %s615_s6  ;;  %v319_v15 = vld [vmem:[%s288_s5 + $0x18] sm:$0xff]  ;;  %v776_v38 = vld [vmem:[%s1109_s1] sm:$0xff] (!%p616_p4)   ;;  %v919_v39 = vmov (!%p616_p4), 0.0   ;;  %vm920_vm3 = vmmov (!%p616_p4), 0   ;;  %v779_v42 = vld [vmem:[%s1109_s1 + $0x18] sm:$0xff] (!%p616_p4)  }
  0x5b   : > { %v322_v9 = vshrl.u32 %v321_v7, 7  ;;  %v337_v33 = vld [vmem:[#allocation2] sm:$0x3]  ;;  %642 = vmatprep.subr.bf16.mxu0 (!%p616_p4), %v919_v39  ;;  %v777_v40 = vld [vmem:[%s1109_s1 + $0x8] sm:$0xff] (!%p616_p4)   ;;  %658 = vmatprep.mubr.msk.bf16.mxu0 (!%p616_p4), %vm920_vm3, %v919_v39  ;;  %v780_v43 = vld [vmem:[%s1109_s1 + $0x20] sm:$0xff] (!%p616_p4)  }
  0x5c   : > { %643 = vmatpush3.bf16.msra.mxu0 (!%p616_p4), %v776_v38  ;;  %v778_v41 = vld [vmem:[%s1109_s1 + $0x10] sm:$0xff] (!%p616_p4)   ;;  %v781_v44 = vld [vmem:[%s1109_s1 + $0x28] sm:$0xff] (!%p616_p4)   ;;  %v783_v48 = vld [vmem:[%s1109_s1 + $0x38] sm:$0xff] (!%p616_p4)  }
  0x5d   : > { %v323_v12 = vadd.s32 8, %v322_v9  ;;  %v325_v13 = vadd.s32 %v324_v8, %v322_v9  ;;  %644 = vmatprep.subr.bf16.mxu0 (!%p616_p4), %v919_v39  ;;  %v782_v45 = vld [vmem:[%s1109_s1 + $0x30] sm:$0xff] (!%p616_p4)   ;;  %v617_v50 = vld [vmem:[%s1110_s2] ss:$0 sm:$0xff] (!%p616_p4) }
  0x5f   : > { %v326_v16 = vadd.s32 %v324_v8, %v323_v12  ;;  %vm327_vm0 = vcmp.lt.s32.totalorder %v325_v13, 20 }
  0x60   : > { %v333_v17 = vsel %vm327_vm0, %v316_v10, 0.0  ;;  %v335_v18 = vsel %vm327_vm0, %v318_v11, 0.0  ;;  %645 = vmatpush3.bf16.msra.mxu0 (!%p616_p4), %v777_v40 }
  0x61   : > { %vm328_vm1 = vcmp.lt.s32.totalorder %v326_v16, 20  ;;  %646 = vmatprep.subr.bf16.mxu0 (!%p616_p4), %v919_v39 }
  0x62   : > { %v334_v19 = vsel %vm328_vm1, %v317_v14, 0.0  ;;  %v336_v20 = vsel %vm328_vm1, %v319_v15, 0.0 }
  0x63   : > { %v338_v21 = vadd.f32 %v334_v19, %v333_v17  ;;  %v345_v22 = vadd.f32 %v336_v20, %v335_v18 }
  0x64   : > { %647 = vmatpush3.bf16.msra.mxu0 (!%p616_p4), %v778_v41 }
  0x65   : > { %v339_v23 = vrot.slane %v338_v21, 4  ;;  %v346_v24 = vrot.slane %v345_v22, 4  ;;  %648 = vmatprep.subr.bf16.mxu0 (!%p616_p4), %v919_v39 }
  0x67   : > { %v340_v25 = vadd.f32 %v339_v23, %v338_v21  ;;  %v347_v26 = vadd.f32 %v346_v24, %v345_v22 }
  0x68   : > { %649 = vmatpush3.bf16.msra.mxu0 (!%p616_p4), %v779_v42 }
  0x69   : > { %v341_v27 = vrot.slane %v340_v25, 2  ;;  %v348_v28 = vrot.slane %v347_v26, 2  ;;  %650 = vmatprep.subr.bf16.mxu0 (!%p616_p4), %v919_v39 }
  0x6b   : > { %v342_v29 = vadd.f32 %v341_v27, %v340_v25  ;;  %v349_v30 = vadd.f32 %v348_v28, %v347_v26 }
  0x6c   : > { %651 = vmatpush3.bf16.msra.mxu0 (!%p616_p4), %v780_v43 }
  0x6d   : > { %v343_v31 = vrot.slane %v342_v29, 1  ;;  %v350_v32 = vrot.slane %v349_v30, 1  ;;  %652 = vmatprep.subr.bf16.mxu0 (!%p616_p4), %v919_v39 }
  0x6e   : > { %362 = sbr.rel (%p616_p4) target bundleno = 343 (0x157), region = 92 }
  0x6f   : > { %v344_v34 = vadd.f32 %v343_v31, %v342_v29  ;;  %v351_v35 = vadd.f32 %v350_v32, %v349_v30 }
  0x70   : > { %653 = vmatpush3.bf16.msra.mxu0 (!%p616_p4), %v781_v44 }
  0x71   : > { %v355_v36 = vsel %vm354_vm2, %v351_v35, %v344_v34  ;;  %654 = vmatprep.subr.bf16.mxu0 (!%p616_p4), %v919_v39 }
  0x72   : > { %v357_v37 = vadd.f32 %v355_v36, %v337_v33 }
  0x74   : > { %358 = vst [vmem:[#allocation2] sm:$0x3] %v357_v37  ;;  %655 = vmatpush3.bf16.msra.mxu0 (!%p616_p4), %v782_v45 }
  0x75   : > { %656 = vmatprep.subr.bf16.mxu0 %v919_v39 }
  0x78   : > { %657 = vmatpush3.bf16.msra.mxu0 %v783_v48 }
  0x7b   : > { %v363_v46 = vld [vmem:[#allocation2] sm:$0x3] }
  0x7c   : > { %v364_v47 = vmul.f32 0.05, %v363_v46 }
  0x7e   : > { %v365_v49 = vpack.c.bf16 %v364_v47, %v364_v47 }
  0x80   : > { %659 = vmatmul.mubr.bf16.vlgmr.msra.gmra.mrb[0].mxu0 %v365_v49 }
 0x153   : > { %v471_v51 = vpop.f32.mrb[0].mxu0 }
 0x154   : > { %v472_v52 = vadd.f32 %v617_v50, %v471_v51  ;;  %v660_v53 = vpop.f32.mrb[1].mxu0 }
 0x155   : > { %v474_v54 = vpop.f32.mrb[2].mxu0 }
 0x156   : > { %477 = vst [vmem:[#allocation4] sm:$0x3] %v472_v52  ;;  %v661_v55 = vpop.f32.mrb[3].mxu0 }
 0x157 PF: > { %p1067_p5 = scmp.eq.s32.totalorder %s594_s17, 1  ;;  %s921_s5 = smov [#allocation4]  }
 0x158   : > { %s487_s6 = sshll.u32 %s921_s5, 4  ;;  %s488_s6 = int_to_ptr.vmem [resolvable:$true] %s487_s6 }
 0x159   : > { %s784_s12 = scalar_lea.vmem %s488_s6, 32  ;;  %p791_p9 = scmp.lt.s32.totalorder %s488_s6, %s488_s6 }
 0x15a   : > { %p785_p6 = scmp.ne.s32.totalorder %s488_s6, %s784_s12  ;;  %p792_p10 = scmp.lt.s32.totalorder %s784_s12, %s784_s12 }
 0x15c   : > { %p786_p7 = pnand %p785_p6, %p1067_p5  ;;  %p793_p11 = por %p792_p10, %p791_p9 }
 0x15e   : > { %p787_p8 = pneg %p786_p7 }
 0x160   : > { %p794_p12 = pnand %p793_p11, %p787_p8 }
 0x162   : > { %797 = shalt.err (!%p794_p12)
}
 0x163   : > { %s798_s17 = scalar_lea.hbm %s1111_s3, 32 }
 0x164   : > { %p799_p13 = scmp.ne.s32.totalorder %s1111_s3, %s798_s17  ;;  %p804_p2 = scmp.lt.u32.totalorder %s798_s17, %s1111_s3 }
 0x166   : > { %p800_p0 = pnand %p799_p13, %p1067_p5 }
 0x168   : > { %p801_p1 = pneg %p800_p0 }
 0x16a   : > { %p806_p3 = pnand %p804_p2, %p801_p1 }
 0x16c   : > { %809 = shalt.err (!%p806_p3)
}
 0x16d   : > { %663 = dma.vmem_to_hbm [thread:$0]  (%p1067_p5), %s488_s6, 32, %s1111_s3, [#allocation5]  }
 0x16e   : > { %863 = dma.done.wait (%p1067_p5), [#allocation5], 32  }
 0x16f   : > { %865 = vsyncadd (%p1067_p5), [#allocation5], 4294967264 }
 0x170 PF: > { %s14_s16 = sadd.s32 1, %s884_s16   ;;  %s1116_s12 = smov %s872_s13 }
 0x171   : > { %p11_p4 = scmp.ge.s32.totalorder %s14_s16, 4   ;;  %s1117_s13 = smov %s978_s21 }
 0x172   : > { %s1118_s14 = smov %s880_s15  ;;  %s1119_s15 = smov %s1121_s18 }
 0x173   :  { %13 = sbr.rel (!%p11_p4) target bundleno = 3 (0x3), region = 155 }
 0x17a   :  { %500 = vsyncpa [#allocation5], 1 }
 0x17b   :  { %502 = vsyncpa [#allocation5 + $0x1], 1 }

</bundles_post_ra>
